<compile_context>
chip_gen: v7x
topology: tpu7x:2x2x1
jax: 0.10.0
libtpu: 0.0.40
codegen_flags: <defaults>
</compile_context>

<pallas_src>
import functools

import jax
import jax.numpy as jnp
from jax import lax
from jax.experimental import pallas as pl
from jax.experimental.pallas import tpu as pltpu


def _pick_tile(extent, target):
    """Largest divisor of `extent` that is <= target and a multiple of 8
    (falls back to the full extent only when no such divisor exists)."""
    target = min(target, extent)
    for t in range(target, 0, -1):
        if extent % t == 0 and (t % 8 == 0 or t == extent):
            return t
    return extent


def _default_vmem_limit_bytes():
    # ~3/4 of physical VMEM, capped at 100 MiB (v5e/v6e: 128 MiB -> 96 MiB,
    # v7x: 64 MiB -> 48 MiB).  Falls back to 48 MiB if the query fails.
    try:
        cap = pltpu.get_tpu_info().vmem_capacity_bytes
        return int(min(100 * 1024 * 1024, (cap * 3) // 4))
    except Exception:
        return 48 * 1024 * 1024


def _qkv_proj_kernel(x_ref, w_ref, b_ref, o_ref):
    # x_ref: (1, ts, D) [compute dtype]; w_ref: (D, 3*H*Dh) [compute dtype];
    # b_ref: (1, 3*H*Dh) fp32.  One lane-dense MXU matmul per sequence tile.
    y = jnp.dot(x_ref[0], w_ref[...], preferred_element_type=jnp.float32)
    o_ref[0] = (y + b_ref[...]).astype(o_ref.dtype)


def _mhsa_flash_kernel(q_ref, k_ref, v_ref, wo_ref, bo_ref, o_ref,
                       m_sc, l_sc, acc_sc, *, approx_reciprocal):
    ki = pl.program_id(2)

    @pl.when(ki == 0)
    def _init():
        m_sc[...] = jnp.full(m_sc.shape, -jnp.inf, dtype=m_sc.dtype)
        l_sc[...] = jnp.zeros(l_sc.shape, dtype=l_sc.dtype)
        acc_sc[...] = jnp.zeros(acc_sc.shape, dtype=acc_sc.dtype)

    q = q_ref[0]          # (H, tq, Dh), compute dtype, resident across ki
    k = k_ref[0]          # (H, tk, Dh)
    v = v_ref[0]          # (H, tk, Dh)

    # scores = einsum('hqe,hke->hqk') -- NO 1/sqrt(d) scaling (matches module).
    s = lax.dot_general(q, k,
                        dimension_numbers=(((2,), (2,)), ((0,), (0,))),
                        preferred_element_type=jnp.float32)        # (H, tq, tk)

    # ---- online softmax over key tiles (fp32 running stats) ----
    m_prev = m_sc[...]                                             # (H, tq, 1)
    m_new = jnp.maximum(m_prev, jnp.max(s, axis=-1, keepdims=True))
    alpha = jnp.exp(m_prev - m_new)
    p = jnp.exp(s - m_new)                                         # (H, tq, tk)
    l_sc[...] = alpha * l_sc[...] + jnp.sum(p, axis=-1, keepdims=True)
    pv = lax.dot_general(p.astype(v.dtype), v,
                         dimension_numbers=(((2,), (1,)), ((0,), (0,))),
                         preferred_element_type=jnp.float32)       # (H, tq, Dh)
    acc_sc[...] = alpha * acc_sc[...] + pv
    m_sc[...] = m_new

    # ---- finalize: normalize + fused output projection ----
    @pl.when(ki == pl.num_programs(2) - 1)
    def _finalize():
        inv_l = pl.reciprocal(l_sc[...], approx=approx_reciprocal)
        agg = (acc_sc[...] * inv_l).astype(wo_ref.dtype)           # (H, tq, Dh)
        # out_h = einsum('hqe,hef->hqf'); summing over h == concat(heads) @ Wo
        out_h = lax.dot_general(agg, wo_ref[...],
                                dimension_numbers=(((2,), (1,)), ((0,), (0,))),
                                preferred_element_type=jnp.float32)  # (H, tq, Dp)
        o_ref[0] = (jnp.sum(out_h, axis=0) + bo_ref[...]).astype(o_ref.dtype)


def multi_head_self_attention(x, params, *, num_heads, block_q=256, block_k=256,
                              block_proj=512, compute_dtype=jnp.bfloat16,
                              approx_reciprocal=None):
    """x: (B, S, D) float32.  params: (in,out)-layout weights + (1,out) biases."""
    B, S, D = x.shape
    H = num_heads
    Dh = D                      # head_dim == input_dim in this module
    if approx_reciprocal is None:
        approx_reciprocal = (compute_dtype != jnp.float32)

    tq = _pick_tile(S, block_q)
    tk = _pick_tile(S, block_k)
    ts = _pick_tile(S, block_proj)
    Dp = D if D % 128 == 0 else ((D + 127) // 128) * 128   # lane-dense output
    vmem_limit = _default_vmem_limit_bytes()

    f32 = jnp.float32
    # One-time wrapper-side casts/reshapes; nothing re-cast inside the kernels.
    w_qkv = jnp.concatenate([params["wq"], params["wk"], params["wv"]],
                            axis=1).astype(compute_dtype)           # (D, 3*H*Dh)
    b_qkv = jnp.concatenate([params["bq"], params["bk"], params["bv"]],
                            axis=1).astype(f32)                     # (1, 3*H*Dh)
    wo = params["wo"].reshape(H, Dh, D).astype(compute_dtype)       # (H, Dh, D)
    bo = params["bo"].reshape(1, D).astype(f32)
    if Dp != D:
        wo = jnp.pad(wo, ((0, 0), (0, 0), (0, Dp - D)))
        bo = jnp.pad(bo, ((0, 0), (0, Dp - D)))
    x_c = x.astype(compute_dtype)

    flash_kernel = functools.partial(_mhsa_flash_kernel,
                                     approx_reciprocal=approx_reciprocal)

    def build_and_run(single_buffer_consts):
        def resident(shape, imap):
            # Constant-index blocks: fetched once; single-buffered when supported.
            if single_buffer_consts:
                return pl.BlockSpec(shape, imap, pipeline_mode=pl.Buffered(1))
            return pl.BlockSpec(shape, imap)

        # ---- 1) fused QKV projection: qkv = x @ [Wq|Wk|Wv] + [bq|bk|bv] ----
        qkv = pl.pallas_call(
            _qkv_proj_kernel,
            out_shape=jax.ShapeDtypeStruct((B, S, 3 * H * Dh), compute_dtype),
            grid_spec=pltpu.PrefetchScalarGridSpec(
                num_scalar_prefetch=0,
                grid=(B, S // ts),
                in_specs=[
                    pl.BlockSpec((1, ts, D), lambda b, si: (b, si, 0)),
                    resident((D, 3 * H * Dh), lambda b, si: (0, 0)),
                    resident((1, 3 * H * Dh), lambda b, si: (0, 0)),
                ],
                out_specs=pl.BlockSpec((1, ts, 3 * H * Dh),
                                       lambda b, si: (b, si, 0)),
            ),
            compiler_params=pltpu.CompilerParams(
                dimension_semantics=("parallel", "parallel"),
                vmem_limit_bytes=vmem_limit),
        )(x_c, w_qkv, b_qkv)

        # Per-head layout (B, H, S, Dh) -- a single XLA transpose, done once,
        # outside the flash loop (K/V are never re-projected per query tile).
        qkv = qkv.reshape(B, S, 3, H, Dh)
        q = jnp.transpose(qkv[:, :, 0], (0, 2, 1, 3))
        k = jnp.transpose(qkv[:, :, 1], (0, 2, 1, 3))
        v = jnp.transpose(qkv[:, :, 2], (0, 2, 1, 3))

        # ---- 2) flash attention + fused output projection ----
        return pl.pallas_call(
            flash_kernel,
            out_shape=jax.ShapeDtypeStruct((B, S, Dp), x.dtype),
            grid_spec=pltpu.PrefetchScalarGridSpec(
                num_scalar_prefetch=0,
                grid=(B, S // tq, S // tk),
                in_specs=[
                    pl.BlockSpec((1, H, tq, Dh), lambda b, qi, ki: (b, 0, qi, 0)),
                    pl.BlockSpec((1, H, tk, Dh), lambda b, qi, ki: (b, 0, ki, 0)),
                    pl.BlockSpec((1, H, tk, Dh), lambda b, qi, ki: (b, 0, ki, 0)),
                    resident((H, Dh, Dp), lambda b, qi, ki: (0, 0, 0)),
                    resident((1, Dp), lambda b, qi, ki: (0, 0)),
                ],
                out_specs=pl.BlockSpec((1, tq, Dp), lambda b, qi, ki: (b, qi, 0)),
                scratch_shapes=[
                    pltpu.VMEM((H, tq, 1), jnp.float32),    # running max
                    pltpu.VMEM((H, tq, 1), jnp.float32),    # running denom
                    pltpu.VMEM((H, tq, Dh), jnp.float32),   # output accumulator
                ],
            ),
            compiler_params=pltpu.CompilerParams(
                dimension_semantics=("parallel", "parallel", "arbitrary"),
                vmem_limit_bytes=vmem_limit),
        )(q, k, v, wo, bo)

    try:
        out_padded = build_and_run(hasattr(pl, "Buffered"))
    except Exception:
        # Fallback: default double-buffering of the constant weight blocks.
        out_padded = build_and_run(False)

    return out_padded[..., :D] if Dp != D else out_padded


def _reference(x, params, *, num_heads):
    """Pure-JAX reference mirroring the PyTorch forward exactly."""
    B, S, D = x.shape
    q = (x @ params["wq"] + params["bq"]).reshape(B, S, num_heads, D)
    k = (x @ params["wk"] + params["bk"]).reshape(B, S, num_heads, D)
    v = (x @ params["wv"] + params["bv"]).reshape(B, S, num_heads, D)
    scores = jnp.einsum("bqhd,bkhd->bhqk", q, k)
    attn = jax.nn.softmax(scores, axis=-1)
    agg = jnp.einsum("bhqk,bkhd->bqhd", attn, v).reshape(B, S, -1)
    return agg @ params["wo"] + params["bo"]


if __name__ == "__main__":
    B, S, D, H = 2, 8, 32, 4
    HD = D * H

    key = jax.random.PRNGKey(0)
    ks = jax.random.split(key, 9)
    scale = 0.1
    params = {
        "wq": scale * jax.random.normal(ks[0], (D, HD), jnp.float32),
        "bq": scale * jax.random.normal(ks[1], (1, HD), jnp.float32),
        "wk": scale * jax.random.normal(ks[2], (D, HD), jnp.float32),
        "bk": scale * jax.random.normal(ks[3], (1, HD), jnp.float32),
        "wv": scale * jax.random.normal(ks[4], (D, HD), jnp.float32),
        "bv": scale * jax.random.normal(ks[5], (1, HD), jnp.float32),
        "wo": scale * jax.random.normal(ks[6], (HD, D), jnp.float32),
        "bo": scale * jax.random.normal(ks[7], (1, D), jnp.float32),
    }
    x = jax.random.normal(ks[8], (B, S, D), jnp.float32)

    ref = _reference(x, params, num_heads=H)

    # Exact fp32 MXU path (strict correctness check).
    out_exact = multi_head_self_attention(x, params, num_heads=H,
                                          compute_dtype=jnp.float32)
    out_exact = jax.block_until_ready(out_exact)
    assert out_exact.shape == (B, S, D)
    assert jnp.allclose(out_exact, ref, atol=1e-4, rtol=1e-4), \
        "fp32 kernel mismatch vs reference"

    # Fast bf16-operand path (default; fp32 accumulation), looser tolerance.
    out_fast = multi_head_self_attention(x, params, num_heads=H)
    out_fast = jax.block_until_ready(out_fast)
    assert out_fast.shape == (B, S, D)
    assert jnp.allclose(out_fast, ref, atol=5e-2, rtol=5e-2), \
        "bf16 kernel mismatch vs reference"

    print("KERNEL_OK")
</pallas_src>

<mosaic_0001>
module attributes {stable_mosaic.version = 11 : i64} {
  func.func @_qkv_proj_kernel(%arg0: i32, %arg1: i32, %arg2: memref<1x8x32xf32, #tpu.memory_space<vmem>>, %arg3: memref<32x384xf32, #tpu.memory_space<vmem>>, %arg4: memref<1x384xf32, #tpu.memory_space<vmem>>, %arg5: memref<1x8x384xf32, #tpu.memory_space<vmem>>) attributes {dimension_semantics = [#tpu.dimension_semantics<parallel>, #tpu.dimension_semantics<parallel>], iteration_bounds = array<i64: 2, 1>, scalar_prefetch = 0 : i64, scratch_operands = 0 : i64, tpu.core_type = #tpu.core_type<tc>, window_params = [{transform_indices = @transform_0, window_bounds = array<i64: 1, 8, 32>}, {pipeline_mode = #tpu.pipeline_mode<synchronous>, transform_indices = @transform_1, window_bounds = array<i64: 32, 384>}, {pipeline_mode = #tpu.pipeline_mode<synchronous>, transform_indices = @transform_2, window_bounds = array<i64: 1, 384>}, {transform_indices = @transform_3, window_bounds = array<i64: 1, 8, 384>}]} {
    %c0 = arith.constant 0 : index
    %c0_0 = arith.constant 0 : index
    %c0_1 = arith.constant 0 : index
    %0 = vector.load %arg2[%c0, %c0_0, %c0_1] : memref<1x8x32xf32, #tpu.memory_space<vmem>>, vector<1x8x32xf32>
    %1 = vector.shape_cast %0 : vector<1x8x32xf32> to vector<8x32xf32>
    %c0_2 = arith.constant 0 : index
    %c0_3 = arith.constant 0 : index
    %2 = vector.load %arg3[%c0_2, %c0_3] : memref<32x384xf32, #tpu.memory_space<vmem>>, vector<32x384xf32>
    %cst = arith.constant dense<0.000000e+00> : vector<8x384xf32>
    %3 = tpu.matmul %1, %2, %cst {dimension_numbers = #tpu.dot_dimension_numbers<[1], [0], [0], [1], [0, 0, 1, 1], [], []>} : vector<8x32xf32>, vector<32x384xf32>, vector<8x384xf32> -> vector<8x384xf32>
    %c0_4 = arith.constant 0 : index
    %c0_5 = arith.constant 0 : index
    %4 = vector.load %arg4[%c0_4, %c0_5] : memref<1x384xf32, #tpu.memory_space<vmem>>, vector<1x384xf32>
    %5 = vector.broadcast %4 : vector<1x384xf32> to vector<8x384xf32>
    %6 = arith.addf %3, %5 : vector<8x384xf32>
    %c0_6 = arith.constant 0 : index
    %c0_7 = arith.constant 0 : index
    %c0_8 = arith.constant 0 : index
    %7 = vector.load %arg5[%c0_6, %c0_7, %c0_8] : memref<1x8x384xf32, #tpu.memory_space<vmem>>, vector<1x8x384xf32>
    %8 = vector.shape_cast %7 : vector<1x8x384xf32> to vector<8x384xf32>
    %9 = vector.shape_cast %6 : vector<8x384xf32> to vector<1x8x384xf32>
    tpu.vector_store %arg5[%c0_6, %c0_7, %c0_8], %9 {strides = array<i32>} : memref<1x8x384xf32, #tpu.memory_space<vmem>>, vector<1x8x384xf32>,
    return
  }
  func.func @transform_0(%arg0: i32, %arg1: i32) -> (i32, i32, i32) {
    %c0_i32 = arith.constant 0 : i32
    %c0_i32_0 = arith.constant 0 : i32
    return %arg0, %arg1, %c0_i32 : i32, i32, i32
  }
  func.func @transform_1(%arg0: i32, %arg1: i32) -> (i32, i32) {
    %c0_i32 = arith.constant 0 : i32
    %c0_i32_0 = arith.constant 0 : i32
    %c0_i32_1 = arith.constant 0 : i32
    return %c0_i32, %c0_i32_0 : i32, i32
  }
  func.func @transform_2(%arg0: i32, %arg1: i32) -> (i32, i32) {
    %c0_i32 = arith.constant 0 : i32
    %c0_i32_0 = arith.constant 0 : i32
    %c0_i32_1 = arith.constant 0 : i32
    return %c0_i32, %c0_i32_0 : i32, i32
  }
  func.func @transform_3(%arg0: i32, %arg1: i32) -> (i32, i32, i32) {
    %c0_i32 = arith.constant 0 : i32
    %c0_i32_0 = arith.constant 0 : i32
    return %arg0, %arg1, %c0_i32 : i32, i32, i32
  }
}

module attributes {stable_mosaic.version = 11 : i64} {
  func.func @_qkv_proj_kernel(%arg0: i32, %arg1: i32, %arg2: memref<1x8x32xf32, #tpu.memory_space<vmem>>, %arg3: memref<32x384xf32, #tpu.memory_space<vmem>>, %arg4: memref<1x384xf32, #tpu.memory_space<vmem>>, %arg5: memref<1x8x384xf32, #tpu.memory_space<vmem>>) attributes {dimension_semantics = [#tpu.dimension_semantics<parallel>, #tpu.dimension_semantics<parallel>], iteration_bounds = array<i64: 2, 1>, scalar_prefetch = 0 : i64, scratch_operands = 0 : i64, tpu.core_type = #tpu.core_type<tc>, window_params = [{transform_indices = @transform_0, window_bounds = array<i64: 1, 8, 32>}, {pipeline_mode = #tpu.pipeline_mode<synchronous>, transform_indices = @transform_1, window_bounds = array<i64: 32, 384>}, {pipeline_mode = #tpu.pipeline_mode<synchronous>, transform_indices = @transform_2, window_bounds = array<i64: 1, 384>}, {transform_indices = @transform_3, window_bounds = array<i64: 1, 8, 384>}]} {
    %c0 = arith.constant 0 : index
    %c0_0 = arith.constant 0 : index
    %c0_1 = arith.constant 0 : index
    %0 = vector.load %arg2[%c0, %c0_0, %c0_1] : memref<1x8x32xf32, #tpu.memory_space<vmem>>, vector<1x8x32xf32>
    %1 = vector.shape_cast %0 : vector<1x8x32xf32> to vector<8x32xf32>
    %c0_2 = arith.constant 0 : index
    %c0_3 = arith.constant 0 : index
    %2 = vector.load %arg3[%c0_2, %c0_3] : memref<32x384xf32, #tpu.memory_space<vmem>>, vector<32x384xf32>
    %cst = arith.constant dense<0.000000e+00> : vector<8x384xf32>
    %3 = tpu.matmul %1, %2, %cst {dimension_numbers = #tpu.dot_dimension_numbers<[1], [0], [0], [1], [0, 0, 1, 1], [], []>} : vector<8x32xf32>, vector<32x384xf32>, vector<8x384xf32> -> vector<8x384xf32>
    %c0_4 = arith.constant 0 : index
    %c0_5 = arith.constant 0 : index
    %4 = vector.load %arg4[%c0_4, %c0_5] : memref<1x384xf32, #tpu.memory_space<vmem>>, vector<1x384xf32>
    %5 = vector.broadcast %4 : vector<1x384xf32> to vector<8x384xf32>
    %6 = arith.addf %3, %5 : vector<8x384xf32>
    %c0_6 = arith.constant 0 : index
    %c0_7 = arith.constant 0 : index
    %c0_8 = arith.constant 0 : index
    %7 = vector.load %arg5[%c0_6, %c0_7, %c0_8] : memref<1x8x384xf32, #tpu.memory_space<vmem>>, vector<1x8x384xf32>
    %8 = vector.shape_cast %7 : vector<1x8x384xf32> to vector<8x384xf32>
    %9 = vector.shape_cast %6 : vector<8x384xf32> to vector<1x8x384xf32>
    tpu.vector_store %arg5[%c0_6, %c0_7, %c0_8], %9 {strides = array<i32>} : memref<1x8x384xf32, #tpu.memory_space<vmem>>, vector<1x8x384xf32>,
    return
  }
  func.func @transform_0(%arg0: i32, %arg1: i32) -> (i32, i32, i32) {
    %c0_i32 = arith.constant 0 : i32
    %c0_i32_0 = arith.constant 0 : i32
    return %arg0, %arg1, %c0_i32 : i32, i32, i32
  }
  func.func @transform_1(%arg0: i32, %arg1: i32) -> (i32, i32) {
    %c0_i32 = arith.constant 0 : i32
    %c0_i32_0 = arith.constant 0 : i32
    %c0_i32_1 = arith.constant 0 : i32
    return %c0_i32, %c0_i32_0 : i32, i32
  }
  func.func @transform_2(%arg0: i32, %arg1: i32) -> (i32, i32) {
    %c0_i32 = arith.constant 0 : i32
    %c0_i32_0 = arith.constant 0 : i32
    %c0_i32_1 = arith.constant 0 : i32
    return %c0_i32, %c0_i32_0 : i32, i32
  }
  func.func @transform_3(%arg0: i32, %arg1: i32) -> (i32, i32, i32) {
    %c0_i32 = arith.constant 0 : i32
    %c0_i32_0 = arith.constant 0 : i32
    return %arg0, %arg1, %c0_i32 : i32, i32, i32
  }
}

</mosaic_0001>

<bundles_post_ra>
// kernel: tpu_custom_call.1
= control target key start
LH: loop header
LB: loop body
LE: loop exit
PB: predicated region body
PF: predicated region fallthrough
CT: control target
= control target key end

     0   :  { %8 = vsyncpa [#allocation3], 0  ;;  %s1025_s0 = inlined_call_operand.hbm [shape: f32[2,8,32], index: 0, kind: input, shape index: {}]   ;;  %s1026_s1 = inlined_call_operand.hbm [shape: f32[32,384], index: 1, kind: input, shape index: {}]   ;;  %s1027_s2 = inlined_call_operand.vmem [shape: f32[1,384], index: 2, kind: input, shape index: {}]   ;;  %s1028_s3 = inlined_call_operand.hbm [shape: f32[2,8,384], index: 3, kind: output, shape index: {}]  }
   0x1   :  { %10 = vsyncpa [#allocation3 + $0x1], 0 }
   0x2   :  { %11 = vsyncpa [#allocation6], 0 }
   0x3   :  { %12 = vsyncpa [#allocation4], 0 }
   0x4   :  { %14 = vsyncpa [#allocation4 + $0x1], 0  ;;  %s804_s12 = smov 0   ;;  %s806_s13 = smov 0  }
   0x5   :  { %s808_s14 = smov 0   ;;  %s810_s15 = smov 0  }
   0x6   :  { %s812_s16 = smov 0   ;;  %s814_s17 = smov 0  }
   0x7 LB: > { %s505_s18 = sadd.s32 4294967295, %s774_s17   ;;  %s506_s19 = sadd.s32 4294967294, %s774_s17   ;;  %s774_s17 = sphi %s814_s17, %s20_s17   ;;  %s770_s16 = sphi %s812_s16, %s1052_s16   ;;  %s766_s15 = sphi %s810_s15, %s1051_s15   ;;  %s762_s14 = sphi %s808_s14, %s1050_s14   ;;  %s758_s13 = sphi %s806_s13, %s1049_s13   ;;  %s754_s12 = sphi %s804_s12, %s1048_s12  }
   0x8   : > { %p54_p0 = scmp.ne.s32.totalorder %s758_s13, %s754_s12  ;;  %p838_p1 = scmp.eq.s32.totalorder %s505_s18, 0 }
   0x9   : > { %p842_p2 = scmp.eq.s32.totalorder %s505_s18, 1  ;;  %p128_p3 = scmp.eq.s32.totalorder %s506_s19, 1 }
   0xa   : > { %s1033_s20 = scalar_select %p838_p1, 1, 0 }
   0xb   : > { %s1034_s21 = scalar_select %p842_p2, 1, 0 }
   0xc   : > { %p848_p4 = por %p838_p1, %p54_p0  ;;  %p507_p5 = scmp.ge.s32.totalorder %s774_s17, 1 }
   0xd   : > { %p853_p6 = por %p128_p3, %p54_p0  ;;  %p135_p7 = scmp.lt.s32.totalorder %s774_s17, 3 }
   0xe   : > { %s1035_s22 = scalar_select %p848_p4, 1, 0 }
   0xf   : > { %s1036_s23 = scalar_select %p853_p6, 1, 0 }
  0x10   : > { %p858_p8 = pnand %p507_p5, %p135_p7  ;;  %s776_s25 = smov [#allocation5]  }
  0x11   : > { %s147_s26 = sshll.u32 %s776_s25, 4  ;;  %s32_s28 = sadd.s32 1, %s770_s16  ;;  %s148_s26 = int_to_ptr.vmem [resolvable:$true] %s147_s26 }
  0x12   : > { %s1037_s24 = scalar_select %p858_p8, 1, 0 }
  0x13   : > { %p560_p9 = pneg %p858_p8  ;;  %s630_s4 = scalar_lea.hbm %s1026_s1, 1536 }
  0x14   : > { %p631_p12 = scmp.ne.s32.totalorder %s1026_s1, %s630_s4  ;;  %p637_p5 = scmp.lt.u32.totalorder %s630_s4, %s1026_s1 }
  0x15   : > { %p867_p11 = pnand %p560_p9, %p838_p1 }
  0x17   : > { %p632_p13 = pneg %p867_p11 }
  0x19   : > { %p633_p0 = pnand %p632_p13, %p631_p12 }
  0x1b   : > { %p634_p3 = pneg %p633_p0 }
  0x1d   : > { %p639_p7 = pnand %p637_p5, %p634_p3 }
  0x1f   : > { %642 = shalt.err (!%p639_p7)
}
  0x20   : > { %s643_s9 = scalar_lea.vmem %s148_s26, 1536  ;;  %p651_p1 = scmp.lt.s32.totalorder %s148_s26, %s148_s26 }
  0x21   : > { %p644_p9 = scmp.ne.s32.totalorder %s148_s26, %s643_s9  ;;  %p652_p4 = scmp.lt.s32.totalorder %s643_s9, %s643_s9 }
  0x23   : > { %p646_p10 = pnand %p644_p9, %p632_p13  ;;  %p653_p8 = por %p652_p4, %p651_p1 }
  0x25   : > { %p647_p6 = pneg %p646_p10 }
  0x27   : > { %p654_p2 = pnand %p653_p8, %p647_p6 }
  0x29   : > { %657 = shalt.err (!%p654_p2)
}
  0x2a   : > { %s777_s10 = smov 384   ;;  %s778_s11 = smov 24  }
  0x2b   : > { %563 = dma.hbm_to_vmem [thread:$0]  (!%p867_p11), %s1026_s1, 1536, %s148_s26, [#allocation6], %s777_s10, %s777_s10, %s778_s11  }
  0x2c   : > { %p34_p1 = scmp.ge.s32.totalorder %s32_s28, 2  ;;  %s41_s25 = sadd.s32 1, %s762_s14 }
  0x2d   : > { %p48_p2 = scmp.ne.s32.totalorder %s762_s14, %s758_s13  ;;  %p49_p4 = scmp.eq.s32.totalorder %s774_s17, 0 }
  0x2e   : > { %s1054_s28 = smov (%p34_p1, %s32_s28), 0  ;;  %p1040_p8 = scmp.ne.s32.totalorder %s1034_s21, 0 }
  0x2f   : > { %p894_p6 = por %p49_p4, %p48_p2  ;;  %s36_s27 = ssub.s32 %s770_s16, %s1054_s28 }
  0x30   : > { %p900_p10 = por %p1040_p8, %p48_p2  ;;  %p573_p12 = scmp.lt.s32.totalorder %s774_s17, 2 }
  0x31   : > { %p39_p11 = scmp.eq.s32.totalorder %s36_s27, 0  ;;  %s164_s26 = sand.u32 1, %s762_s14  }
  0x32   : > { %s510_s4 = sshll.u32 %s164_s26, 3  ;;  %s511_s6 = sshll.u32 %s770_s16, 7 }
  0x33   : > { %s909_s5 = scalar_select %p39_p11, %s762_s14, %s41_s25  }
  0x34   : > { %s915_s9 = scalar_lea.hbm %s1025_s0, %s511_s6  ;;  %s168_s21 = scalar_lea.vmem [#allocation2], %s510_s4 }
  0x35   : > { %s176_s10 = sshll.u32 %s168_s21, 4  ;;  %p921_p13 = pnand %p573_p12, %p894_p6  ;;  %s917_s10 = int_to_ptr.vmem [resolvable:$true] %s176_s10 }
  0x36   : > { %s165_s18 = scalar_lea.sflag [#allocation3], %s164_s26  ;;  %s658_s19 = scalar_lea.hbm %s915_s9, 128 }
  0x37   : > { %p659_p0 = scmp.ne.s32.totalorder %s915_s9, %s658_s19  ;;  %p660_p3 = pneg %p921_p13 }
  0x38   : > { %s663_s4 = scalar_lea.hbm %s1025_s0, 256  ;;  %p664_p9 = scmp.lt.u32.totalorder %s915_s9, %s1025_s0 }
  0x39   : > { %p661_p5 = pnand %p660_p3, %p659_p0  ;;  %p665_p1 = scmp.lt.u32.totalorder %s663_s4, %s658_s19 }
  0x3a   : > { %p667_p4 = scmp.lt.u32.totalorder %s658_s19, %s915_s9 }
  0x3b   : > { %p662_p7 = pneg %p661_p5  ;;  %p666_p2 = por %p665_p1, %p664_p9 }
  0x3d   : > { %p668_p6 = por %p667_p4, %p666_p2 }
  0x3f   : > { %p669_p8 = pnand %p668_p6, %p662_p7 }
  0x41   : > { %672 = shalt.err (!%p669_p8)
}
  0x42   : > { %s673_s26 = scalar_lea.vmem %s917_s10, 128  ;;  %s779_s7 = smov [#allocation2]  }
  0x43   : > { %p674_p12 = scmp.ne.s32.totalorder %s917_s10, %s673_s26  ;;  %s678_s8 = sshll.u32 %s779_s7, 4  ;;  %s679_s8 = int_to_ptr.vmem [resolvable:$false] %s678_s8 }
  0x44   : > { %s680_s21 = scalar_lea.vmem %s679_s8, 256  ;;  %p681_p5 = scmp.lt.s32.totalorder %s917_s10, %s679_s8 }
  0x45   : > { %p676_p11 = pnand %p674_p12, %p660_p3  ;;  %p682_p9 = scmp.lt.s32.totalorder %s680_s21, %s673_s26 }
  0x47   : > { %p677_p0 = pneg %p676_p11  ;;  %p683_p1 = por %p682_p9, %p681_p5 }
  0x49   : > { %p684_p2 = pnand %p683_p1, %p677_p0 }
  0x4b   : > { %687 = shalt.err (!%p684_p2)
}
  0x4c   : > { %567 = dma.hbm_to_vmem [thread:$0]  (!%p921_p13), %s915_s9, 128, %s917_s10, %s165_s18  }
  0x4d   : > { %p1043_p7 = scmp.ne.s32.totalorder %s1037_s24, 0 }
  0x4e   : > { %s953_s19 = sand.u32 (!%p1043_p7), 1, %s758_s13   ;;  %p1044_p3 = scmp.ne.s32.totalorder (!%p1043_p7), %s1035_s22, 0 }
  0x4f   : > { %185 = sbr.rel (%p1043_p7) target bundleno = 331 (0x14b), region = 32  ;;  %s513_s25 = sshll.u32 (!%p1043_p7), %s953_s19, 3 }
  0x50   : > { %s188_s27 = scalar_lea.sflag (!%p1043_p7), [#allocation3], %s953_s19  ;;  %s957_s4 = scalar_lea.vmem (!%p1043_p7), [#allocation2], %s513_s25 }
  0x56   : > { %741 = dma.done.wait (%p1044_p3), %s188_s27, 128  }
  0x57   : > { %743 = vsyncadd (%p1044_p3), %s188_s27, 4294967168  ;;  %p1045_p13 = scmp.ne.s32.totalorder %s1033_s20, 0 }
  0x59   : > { %745 = dma.done.wait (%p1045_p13), [#allocation6], 1536  }
  0x5a   : > { %747 = vsyncadd (%p1045_p13), [#allocation6], 4294965760  ;;  %v780_v0 = vmov 0.0|0.0   ;;  %v781_v1 = vmov 0.0   ;;  %vm782_vm0 = vmmov 0   ;;  %v220_v2 = vld [vmem:[#allocation5 + $0x8] sm:$0xff]  ;;  %v233_v21 = vlaneseq }
  0x5b   : > { %544 = vmatprep.subr.bf16.mxu1 %v780_v0  ;;  %316 = vmatprep.mubr.f32.mxu0 %v781_v1  ;;  %v223_v3 = vld [vmem:[#allocation5 + $0x20] sm:$0xff]  ;;  %v222_v6 = vld [vmem:[#allocation5 + $0x18] sm:$0xff]  ;;  %v221_v7 = vld [vmem:[#allocation5 + $0x10] sm:$0xff]  ;;  %vm248_vm1 = vcmask 261120   ;;  %s550_s20 = smul.u32 24, %s953_s19  ;;  %s783_s7 = smov [#allocation7]  }
  0x5c   : > { %533 = vmatprep.mubr.msk.f32.mxu1 %vm782_vm0, %v781_v1  ;;  %v219_v4 = vld [vmem:[#allocation5] sm:$0xff]  ;;  %v536_v5 = vpack.c.bf16 %v223_v3, %v220_v2  ;;  %v224_v8 = vld [vmem:[#allocation5 + $0x28] sm:$0xff]  ;;  %v226_v11 = vld [vmem:[#allocation5 + $0x38] sm:$0xff]  ;;  %v234_v22 = vshrl.u32 %v233_v21, 7  ;;  %s551_s9 = smul.u32 384, %s766_s15  ;;  %s397_s15 = scalar_lea.sflag [#allocation4], %s953_s19 }
  0x5d   : > { %v538_v9 = vpack.c.bf16 %v222_v6, %v219_v4  ;;  %v545_v10 = vpack.c.bf16 %v224_v8, %v221_v7  ;;  %v229_v12 = vld [vmem:[#allocation5 + $0x50] sm:$0xff]  ;;  %v228_v15 = vld [vmem:[#allocation5 + $0x48] sm:$0xff]  ;;  %v227_v16 = vld [vmem:[#allocation5 + $0x40] sm:$0xff]  ;;  %s217_s10 = scalar_lea.vmem [#allocation7], %s550_s20  ;;  %s692_s8 = sshll.u32 %s783_s7, 4  ;;  %s693_s8 = int_to_ptr.vmem [resolvable:$false] %s692_s8 }
  0x5e   : > { %v225_v13 = vld [vmem:[#allocation5 + $0x30] sm:$0xff]  ;;  %537 = vmatprep.subr.bf16.mxu0 %v536_v5  ;;  %v540_v14 = vpack.c.bf16 %v229_v12, %v226_v11  ;;  %v230_v17 = vld [vmem:[#allocation5 + $0x58] sm:$0xff]  ;;  %v235_v23 = vsub.s32 0, %v234_v22  ;;  %v243_v24 = vsub.s32 2, %v234_v22  ;;  %v239_v26 = vsub.s32 1, %v234_v22  ;;  %s413_s11 = sshll.u32 %s217_s10, 4  ;;  %s976_s6 = scalar_lea.hbm %s1028_s3, %s551_s9  ;;  %s978_s11 = int_to_ptr.vmem [resolvable:$true] %s413_s11 }
  0x5f   : > { %539 = vmatpush1.bf16.msra.mxu0 %v538_v9  ;;  %546 = vmatpush3.bf16.msra.mxu1 %v545_v10  ;;  %v542_v18 = vpack.c.bf16 %v228_v15, %v225_v13  ;;  %v548_v19 = vpack.c.bf16 %v230_v17, %v227_v16  ;;  %v218_v20 = vld [vmem:[%s957_s4] sm:$0xff]  ;;  %s688_s26 = scalar_lea.vmem %s978_s11, 384  ;;  %s694_s21 = scalar_lea.vmem %s693_s8, 768 }
  0x60   : > { %541 = vmatprep.subr.bf16.mxu0 %v540_v14  ;;  %547 = vmatprep.subr.bf16.mxu1 %v780_v0  ;;  %v231_v25 = vld [vmem:[%s1027_s2] sm:$0x7]  ;;  %p689_p4 = scmp.ne.s32.totalorder %s978_s11, %s688_s26  ;;  %p695_p12 = scmp.lt.s32.totalorder %s978_s11, %s693_s8 }
  0x61   : > { %v236_v27 = vrot.slane %v231_v25, %v235_v23  ;;  %v244_v28 = vrot.slane %v231_v25, %v243_v24  ;;  %v240_v29 = vrot.slane %v231_v25, %v239_v26  ;;  %p696_p11 = scmp.lt.s32.totalorder %s694_s21, %s688_s26 }
  0x62   : > { %p690_p6 = pnand %p689_p4, %p900_p10 }
  0x63   : > { %543 = vmatpush1.bf16.msra.mxu0 %v542_v18  ;;  %549 = vmatpush3.bf16.msra.mxu1 %v548_v19  ;;  %p697_p0 = por %p696_p11, %p695_p12 }
  0x64   : > { %p691_p8 = pneg %p690_p6 }
  0x66   : > { %515 = vmatmul.mubr.msk.f32.vlgmr.msra.gmra.mrb[0].mxu0 %vm248_vm1, %v218_v20  ;;  %534 = vmatmul.mubr.msk.f32.vlgmr.msra.gmra.mrb[0].mxu1 %vm248_vm1, %v218_v20  ;;  %p698_p5 = pnand %p697_p0, %p691_p8 }
 0x139   : > { %v318_v30 = vpop.f32.mrb[0].mxu0  ;;  %v389_v31 = vpop.f32.mrb[0].mxu1 }
 0x13a   : > { %v319_v32 = vadd.f32 %v318_v30, %v236_v27  ;;  %v390_v33 = vadd.f32 %v389_v31, %v244_v28  ;;  %v320_v34 = vpop.f32.mrb[1].mxu0  ;;  %v535_v35 = vpop.f32.mrb[1].mxu1 }
 0x13b   : > { %v321_v36 = vadd.f32 %v320_v34, %v240_v29 }
 0x13c   : > { %393 = vst [vmem:[%s217_s10] sm:$0xff] %v319_v32  ;;  %395 = vst [vmem:[%s217_s10 + $0x10] sm:$0xff] %v390_v33 }
 0x13d   : > { %394 = vst [vmem:[%s217_s10 + $0x8] sm:$0xff] %v321_v36 }
 0x13e   : > { %701 = shalt.err (!%p698_p5)
}
 0x13f   : > { %s702_s19 = scalar_lea.hbm %s976_s6, 384  ;;  %s706_s4 = scalar_lea.hbm %s1028_s3, 768 }
 0x140   : > { %p703_p9 = scmp.ne.s32.totalorder %s976_s6, %s702_s19  ;;  %p707_p7 = scmp.lt.u32.totalorder %s976_s6, %s1028_s3 }
 0x141   : > { %p708_p3 = scmp.lt.u32.totalorder %s706_s4, %s702_s19  ;;  %p710_p4 = scmp.lt.u32.totalorder %s702_s19, %s976_s6 }
 0x142   : > { %p704_p1 = pnand %p703_p9, %p900_p10 }
 0x143   : > { %p709_p13 = por %p708_p3, %p707_p7 }
 0x144   : > { %p705_p2 = pneg %p704_p1 }
 0x145   : > { %p711_p6 = por %p710_p4, %p709_p13 }
 0x147   : > { %p712_p8 = pnand %p711_p6, %p705_p2 }
 0x149   : > { %715 = shalt.err (!%p712_p8)
}
 0x14a   : > { %558 = dma.vmem_to_hbm [thread:$0]  (%p900_p10), %s978_s11, 384, %s976_s6, %s397_s15  }
 0x14b PF: > { %s425_s24 = sand.u32 1, %s754_s12   ;;  %p1046_p12 = scmp.ne.s32.totalorder %s1036_s23, 0 }
 0x14c   : > { %p1047_p11 = scmp.ge.s32.totalorder %s774_s17, 2  ;;  %s426_s9 = scalar_lea.sflag [#allocation4], %s425_s24 }
 0x14e   : > { %p569_p0 = pnand %p1047_p11, %p1046_p12 }
 0x150   : > { %749 = dma.done.wait (!%p569_p0), %s426_s9, 384  }
 0x151   : > { %751 = vsyncadd (!%p569_p0), %s426_s9, 4294966912  ;;  %s20_s17 = sadd.s32 1, %s774_s17   ;;  %s1048_s12 = smov %s758_s13 }
 0x152   : > { %p17_p5 = scmp.ge.s32.totalorder %s20_s17, 4   ;;  %s1049_s13 = smov %s762_s14 }
 0x153   : > { %s1050_s14 = smov %s909_s5  ;;  %s1051_s15 = smov %s770_s16 }
 0x154   : > { %s1052_s16 = smov %s1054_s28  ;;  %19 = sbr.rel (!%p17_p5) target bundleno = 7 (0x7), region = 81 }
 0x15b   :  { %431 = vsyncpa [#allocation3], 1 }
 0x15c   :  { %433 = vsyncpa [#allocation3 + $0x1], 1 }
 0x15d   :  { %434 = vsyncpa [#allocation6], 1 }
 0x15e   :  { %435 = vsyncpa [#allocation4], 1 }
 0x15f   :  { %437 = vsyncpa [#allocation4 + $0x1], 1 }

// kernel: tpu_custom_call.1
= control target key start
LH: loop header
LB: loop body
LE: loop exit
PB: predicated region body
PF: predicated region fallthrough
CT: control target
= control target key end

     0   :  { %8 = vsyncpa [#allocation3], 0  ;;  %s1025_s0 = inlined_call_operand.hbm [shape: f32[2,8,32], index: 0, kind: input, shape index: {}]   ;;  %s1026_s1 = inlined_call_operand.hbm [shape: f32[32,384], index: 1, kind: input, shape index: {}]   ;;  %s1027_s2 = inlined_call_operand.vmem [shape: f32[1,384], index: 2, kind: input, shape index: {}]   ;;  %s1028_s3 = inlined_call_operand.hbm [shape: f32[2,8,384], index: 3, kind: output, shape index: {}]  }
   0x1   :  { %10 = vsyncpa [#allocation3 + $0x1], 0 }
   0x2   :  { %11 = vsyncpa [#allocation6], 0 }
   0x3   :  { %12 = vsyncpa [#allocation4], 0 }
   0x4   :  { %14 = vsyncpa [#allocation4 + $0x1], 0  ;;  %s804_s12 = smov 0   ;;  %s806_s13 = smov 0  }
   0x5   :  { %s808_s14 = smov 0   ;;  %s810_s15 = smov 0  }
   0x6   :  { %s812_s16 = smov 0   ;;  %s814_s17 = smov 0  }
   0x7 LB: > { %s505_s18 = sadd.s32 4294967295, %s774_s17   ;;  %s506_s19 = sadd.s32 4294967294, %s774_s17   ;;  %s774_s17 = sphi %s814_s17, %s20_s17   ;;  %s770_s16 = sphi %s812_s16, %s1052_s16   ;;  %s766_s15 = sphi %s810_s15, %s1051_s15   ;;  %s762_s14 = sphi %s808_s14, %s1050_s14   ;;  %s758_s13 = sphi %s806_s13, %s1049_s13   ;;  %s754_s12 = sphi %s804_s12, %s1048_s12  }
   0x8   : > { %p54_p0 = scmp.ne.s32.totalorder %s758_s13, %s754_s12  ;;  %p838_p1 = scmp.eq.s32.totalorder %s505_s18, 0 }
   0x9   : > { %p842_p2 = scmp.eq.s32.totalorder %s505_s18, 1  ;;  %p128_p3 = scmp.eq.s32.totalorder %s506_s19, 1 }
   0xa   : > { %s1033_s20 = scalar_select %p838_p1, 1, 0 }
   0xb   : > { %s1034_s21 = scalar_select %p842_p2, 1, 0 }
   0xc   : > { %p848_p4 = por %p838_p1, %p54_p0  ;;  %p507_p5 = scmp.ge.s32.totalorder %s774_s17, 1 }
   0xd   : > { %p853_p6 = por %p128_p3, %p54_p0  ;;  %p135_p7 = scmp.lt.s32.totalorder %s774_s17, 3 }
   0xe   : > { %s1035_s22 = scalar_select %p848_p4, 1, 0 }
   0xf   : > { %s1036_s23 = scalar_select %p853_p6, 1, 0 }
  0x10   : > { %p858_p8 = pnand %p507_p5, %p135_p7  ;;  %s776_s25 = smov [#allocation5]  }
  0x11   : > { %s147_s26 = sshll.u32 %s776_s25, 4  ;;  %s32_s28 = sadd.s32 1, %s770_s16  ;;  %s148_s26 = int_to_ptr.vmem [resolvable:$true] %s147_s26 }
  0x12   : > { %s1037_s24 = scalar_select %p858_p8, 1, 0 }
  0x13   : > { %p560_p9 = pneg %p858_p8  ;;  %s630_s4 = scalar_lea.hbm %s1026_s1, 1536 }
  0x14   : > { %p631_p12 = scmp.ne.s32.totalorder %s1026_s1, %s630_s4  ;;  %p637_p5 = scmp.lt.u32.totalorder %s630_s4, %s1026_s1 }
  0x15   : > { %p867_p11 = pnand %p560_p9, %p838_p1 }
  0x17   : > { %p632_p13 = pneg %p867_p11 }
  0x19   : > { %p633_p0 = pnand %p632_p13, %p631_p12 }
  0x1b   : > { %p634_p3 = pneg %p633_p0 }
  0x1d   : > { %p639_p7 = pnand %p637_p5, %p634_p3 }
  0x1f   : > { %642 = shalt.err (!%p639_p7)
}
  0x20   : > { %s643_s9 = scalar_lea.vmem %s148_s26, 1536  ;;  %p651_p1 = scmp.lt.s32.totalorder %s148_s26, %s148_s26 }
  0x21   : > { %p644_p9 = scmp.ne.s32.totalorder %s148_s26, %s643_s9  ;;  %p652_p4 = scmp.lt.s32.totalorder %s643_s9, %s643_s9 }
  0x23   : > { %p646_p10 = pnand %p644_p9, %p632_p13  ;;  %p653_p8 = por %p652_p4, %p651_p1 }
  0x25   : > { %p647_p6 = pneg %p646_p10 }
  0x27   : > { %p654_p2 = pnand %p653_p8, %p647_p6 }
  0x29   : > { %657 = shalt.err (!%p654_p2)
}
  0x2a   : > { %s777_s10 = smov 384   ;;  %s778_s11 = smov 24  }
  0x2b   : > { %563 = dma.hbm_to_vmem [thread:$0]  (!%p867_p11), %s1026_s1, 1536, %s148_s26, [#allocation6], %s777_s10, %s777_s10, %s778_s11  }
  0x2c   : > { %p34_p1 = scmp.ge.s32.totalorder %s32_s28, 2  ;;  %s41_s25 = sadd.s32 1, %s762_s14 }
  0x2d   : > { %p48_p2 = scmp.ne.s32.totalorder %s762_s14, %s758_s13  ;;  %p49_p4 = scmp.eq.s32.totalorder %s774_s17, 0 }
  0x2e   : > { %s1054_s28 = smov (%p34_p1, %s32_s28), 0  ;;  %p1040_p8 = scmp.ne.s32.totalorder %s1034_s21, 0 }
  0x2f   : > { %p894_p6 = por %p49_p4, %p48_p2  ;;  %s36_s27 = ssub.s32 %s770_s16, %s1054_s28 }
  0x30   : > { %p900_p10 = por %p1040_p8, %p48_p2  ;;  %p573_p12 = scmp.lt.s32.totalorder %s774_s17, 2 }
  0x31   : > { %p39_p11 = scmp.eq.s32.totalorder %s36_s27, 0  ;;  %s164_s26 = sand.u32 1, %s762_s14  }
  0x32   : > { %s510_s4 = sshll.u32 %s164_s26, 3  ;;  %s511_s6 = sshll.u32 %s770_s16, 7 }
  0x33   : > { %s909_s5 = scalar_select %p39_p11, %s762_s14, %s41_s25  }
  0x34   : > { %s915_s9 = scalar_lea.hbm %s1025_s0, %s511_s6  ;;  %s168_s21 = scalar_lea.vmem [#allocation2], %s510_s4 }
  0x35   : > { %s176_s10 = sshll.u32 %s168_s21, 4  ;;  %p921_p13 = pnand %p573_p12, %p894_p6  ;;  %s917_s10 = int_to_ptr.vmem [resolvable:$true] %s176_s10 }
  0x36   : > { %s165_s18 = scalar_lea.sflag [#allocation3], %s164_s26  ;;  %s658_s19 = scalar_lea.hbm %s915_s9, 128 }
  0x37   : > { %p659_p0 = scmp.ne.s32.totalorder %s915_s9, %s658_s19  ;;  %p660_p3 = pneg %p921_p13 }
  0x38   : > { %s663_s4 = scalar_lea.hbm %s1025_s0, 256  ;;  %p664_p9 = scmp.lt.u32.totalorder %s915_s9, %s1025_s0 }
  0x39   : > { %p661_p5 = pnand %p660_p3, %p659_p0  ;;  %p665_p1 = scmp.lt.u32.totalorder %s663_s4, %s658_s19 }
  0x3a   : > { %p667_p4 = scmp.lt.u32.totalorder %s658_s19, %s915_s9 }
  0x3b   : > { %p662_p7 = pneg %p661_p5  ;;  %p666_p2 = por %p665_p1, %p664_p9 }
  0x3d   : > { %p668_p6 = por %p667_p4, %p666_p2 }
  0x3f   : > { %p669_p8 = pnand %p668_p6, %p662_p7 }
  0x41   : > { %672 = shalt.err (!%p669_p8)
}
  0x42   : > { %s673_s26 = scalar_lea.vmem %s917_s10, 128  ;;  %s779_s7 = smov [#allocation2]  }
  0x43   : > { %p674_p12 = scmp.ne.s32.totalorder %s917_s10, %s673_s26  ;;  %s678_s8 = sshll.u32 %s779_s7, 4  ;;  %s679_s8 = int_to_ptr.vmem [resolvable:$false] %s678_s8 }
  0x44   : > { %s680_s21 = scalar_lea.vmem %s679_s8, 256  ;;  %p681_p5 = scmp.lt.s32.totalorder %s917_s10, %s679_s8 }
  0x45   : > { %p676_p11 = pnand %p674_p12, %p660_p3  ;;  %p682_p9 = scmp.lt.s32.totalorder %s680_s21, %s673_s26 }
  0x47   : > { %p677_p0 = pneg %p676_p11  ;;  %p683_p1 = por %p682_p9, %p681_p5 }
  0x49   : > { %p684_p2 = pnand %p683_p1, %p677_p0 }
  0x4b   : > { %687 = shalt.err (!%p684_p2)
}
  0x4c   : > { %567 = dma.hbm_to_vmem [thread:$0]  (!%p921_p13), %s915_s9, 128, %s917_s10, %s165_s18  }
  0x4d   : > { %p1043_p7 = scmp.ne.s32.totalorder %s1037_s24, 0 }
  0x4e   : > { %s953_s19 = sand.u32 (!%p1043_p7), 1, %s758_s13   ;;  %p1044_p3 = scmp.ne.s32.totalorder (!%p1043_p7), %s1035_s22, 0 }
  0x4f   : > { %185 = sbr.rel (%p1043_p7) target bundleno = 331 (0x14b), region = 32  ;;  %s513_s25 = sshll.u32 (!%p1043_p7), %s953_s19, 3 }
  0x50   : > { %s188_s27 = scalar_lea.sflag (!%p1043_p7), [#allocation3], %s953_s19  ;;  %s957_s4 = scalar_lea.vmem (!%p1043_p7), [#allocation2], %s513_s25 }
  0x56   : > { %741 = dma.done.wait (%p1044_p3), %s188_s27, 128  }
  0x57   : > { %743 = vsyncadd (%p1044_p3), %s188_s27, 4294967168  ;;  %p1045_p13 = scmp.ne.s32.totalorder %s1033_s20, 0 }
  0x59   : > { %745 = dma.done.wait (%p1045_p13), [#allocation6], 1536  }
  0x5a   : > { %747 = vsyncadd (%p1045_p13), [#allocation6], 4294965760  ;;  %v780_v0 = vmov 0.0|0.0   ;;  %v781_v1 = vmov 0.0   ;;  %vm782_vm0 = vmmov 0   ;;  %v220_v2 = vld [vmem:[#allocation5 + $0x8] sm:$0xff]  ;;  %v233_v21 = vlaneseq }
  0x5b   : > { %544 = vmatprep.subr.bf16.mxu1 %v780_v0  ;;  %316 = vmatprep.mubr.f32.mxu0 %v781_v1  ;;  %v223_v3 = vld [vmem:[#allocation5 + $0x20] sm:$0xff]  ;;  %v222_v6 = vld [vmem:[#allocation5 + $0x18] sm:$0xff]  ;;  %v221_v7 = vld [vmem:[#allocation5 + $0x10] sm:$0xff]  ;;  %vm248_vm1 = vcmask 261120   ;;  %s550_s20 = smul.u32 24, %s953_s19  ;;  %s783_s7 = smov [#allocation7]  }
  0x5c   : > { %533 = vmatprep.mubr.msk.f32.mxu1 %vm782_vm0, %v781_v1  ;;  %v219_v4 = vld [vmem:[#allocation5] sm:$0xff]  ;;  %v536_v5 = vpack.c.bf16 %v223_v3, %v220_v2  ;;  %v224_v8 = vld [vmem:[#allocation5 + $0x28] sm:$0xff]  ;;  %v226_v11 = vld [vmem:[#allocation5 + $0x38] sm:$0xff]  ;;  %v234_v22 = vshrl.u32 %v233_v21, 7  ;;  %s551_s9 = smul.u32 384, %s766_s15  ;;  %s397_s15 = scalar_lea.sflag [#allocation4], %s953_s19 }
  0x5d   : > { %v538_v9 = vpack.c.bf16 %v222_v6, %v219_v4  ;;  %v545_v10 = vpack.c.bf16 %v224_v8, %v221_v7  ;;  %v229_v12 = vld [vmem:[#allocation5 + $0x50] sm:$0xff]  ;;  %v228_v15 = vld [vmem:[#allocation5 + $0x48] sm:$0xff]  ;;  %v227_v16 = vld [vmem:[#allocation5 + $0x40] sm:$0xff]  ;;  %s217_s10 = scalar_lea.vmem [#allocation7], %s550_s20  ;;  %s692_s8 = sshll.u32 %s783_s7, 4  ;;  %s693_s8 = int_to_ptr.vmem [resolvable:$false] %s692_s8 }
  0x5e   : > { %v225_v13 = vld [vmem:[#allocation5 + $0x30] sm:$0xff]  ;;  %537 = vmatprep.subr.bf16.mxu0 %v536_v5  ;;  %v540_v14 = vpack.c.bf16 %v229_v12, %v226_v11  ;;  %v230_v17 = vld [vmem:[#allocation5 + $0x58] sm:$0xff]  ;;  %v235_v23 = vsub.s32 0, %v234_v22  ;;  %v243_v24 = vsub.s32 2, %v234_v22  ;;  %v239_v26 = vsub.s32 1, %v234_v22  ;;  %s413_s11 = sshll.u32 %s217_s10, 4  ;;  %s976_s6 = scalar_lea.hbm %s1028_s3, %s551_s9  ;;  %s978_s11 = int_to_ptr.vmem [resolvable:$true] %s413_s11 }
  0x5f   : > { %539 = vmatpush1.bf16.msra.mxu0 %v538_v9  ;;  %546 = vmatpush3.bf16.msra.mxu1 %v545_v10  ;;  %v542_v18 = vpack.c.bf16 %v228_v15, %v225_v13  ;;  %v548_v19 = vpack.c.bf16 %v230_v17, %v227_v16  ;;  %v218_v20 = vld [vmem:[%s957_s4] sm:$0xff]  ;;  %s688_s26 = scalar_lea.vmem %s978_s11, 384  ;;  %s694_s21 = scalar_lea.vmem %s693_s8, 768 }
  0x60   : > { %541 = vmatprep.subr.bf16.mxu0 %v540_v14  ;;  %547 = vmatprep.subr.bf16.mxu1 %v780_v0  ;;  %v231_v25 = vld [vmem:[%s1027_s2] sm:$0x7]  ;;  %p689_p4 = scmp.ne.s32.totalorder %s978_s11, %s688_s26  ;;  %p695_p12 = scmp.lt.s32.totalorder %s978_s11, %s693_s8 }
  0x61   : > { %v236_v27 = vrot.slane %v231_v25, %v235_v23  ;;  %v244_v28 = vrot.slane %v231_v25, %v243_v24  ;;  %v240_v29 = vrot.slane %v231_v25, %v239_v26  ;;  %p696_p11 = scmp.lt.s32.totalorder %s694_s21, %s688_s26 }
  0x62   : > { %p690_p6 = pnand %p689_p4, %p900_p10 }
  0x63   : > { %543 = vmatpush1.bf16.msra.mxu0 %v542_v18  ;;  %549 = vmatpush3.bf16.msra.mxu1 %v548_v19  ;;  %p697_p0 = por %p696_p11, %p695_p12 }
  0x64   : > { %p691_p8 = pneg %p690_p6 }
  0x66   : > { %515 = vmatmul.mubr.msk.f32.vlgmr.msra.gmra.mrb[0].mxu0 %vm248_vm1, %v218_v20  ;;  %534 = vmatmul.mubr.msk.f32.vlgmr.msra.gmra.mrb[0].mxu1 %vm248_vm1, %v218_v20  ;;  %p698_p5 = pnand %p697_p0, %p691_p8 }
 0x139   : > { %v318_v30 = vpop.f32.mrb[0].mxu0  ;;  %v389_v31 = vpop.f32.mrb[0].mxu1 }
 0x13a   : > { %v319_v32 = vadd.f32 %v318_v30, %v236_v27  ;;  %v390_v33 = vadd.f32 %v389_v31, %v244_v28  ;;  %v320_v34 = vpop.f32.mrb[1].mxu0  ;;  %v535_v35 = vpop.f32.mrb[1].mxu1 }
 0x13b   : > { %v321_v36 = vadd.f32 %v320_v34, %v240_v29 }
 0x13c   : > { %393 = vst [vmem:[%s217_s10] sm:$0xff] %v319_v32  ;;  %395 = vst [vmem:[%s217_s10 + $0x10] sm:$0xff] %v390_v33 }
 0x13d   : > { %394 = vst [vmem:[%s217_s10 + $0x8] sm:$0xff] %v321_v36 }
 0x13e   : > { %701 = shalt.err (!%p698_p5)
}
 0x13f   : > { %s702_s19 = scalar_lea.hbm %s976_s6, 384  ;;  %s706_s4 = scalar_lea.hbm %s1028_s3, 768 }
 0x140   : > { %p703_p9 = scmp.ne.s32.totalorder %s976_s6, %s702_s19  ;;  %p707_p7 = scmp.lt.u32.totalorder %s976_s6, %s1028_s3 }
 0x141   : > { %p708_p3 = scmp.lt.u32.totalorder %s706_s4, %s702_s19  ;;  %p710_p4 = scmp.lt.u32.totalorder %s702_s19, %s976_s6 }
 0x142   : > { %p704_p1 = pnand %p703_p9, %p900_p10 }
 0x143   : > { %p709_p13 = por %p708_p3, %p707_p7 }
 0x144   : > { %p705_p2 = pneg %p704_p1 }
 0x145   : > { %p711_p6 = por %p710_p4, %p709_p13 }
 0x147   : > { %p712_p8 = pnand %p711_p6, %p705_p2 }
 0x149   : > { %715 = shalt.err (!%p712_p8)
}
 0x14a   : > { %558 = dma.vmem_to_hbm [thread:$0]  (%p900_p10), %s978_s11, 384, %s976_s6, %s397_s15  }
 0x14b PF: > { %s425_s24 = sand.u32 1, %s754_s12   ;;  %p1046_p12 = scmp.ne.s32.totalorder %s1036_s23, 0 }
 0x14c   : > { %p1047_p11 = scmp.ge.s32.totalorder %s774_s17, 2  ;;  %s426_s9 = scalar_lea.sflag [#allocation4], %s425_s24 }
 0x14e   : > { %p569_p0 = pnand %p1047_p11, %p1046_p12 }
 0x150   : > { %749 = dma.done.wait (!%p569_p0), %s426_s9, 384  }
 0x151   : > { %751 = vsyncadd (!%p569_p0), %s426_s9, 4294966912  ;;  %s20_s17 = sadd.s32 1, %s774_s17   ;;  %s1048_s12 = smov %s758_s13 }
 0x152   : > { %p17_p5 = scmp.ge.s32.totalorder %s20_s17, 4   ;;  %s1049_s13 = smov %s762_s14 }
 0x153   : > { %s1050_s14 = smov %s909_s5  ;;  %s1051_s15 = smov %s770_s16 }
 0x154   : > { %s1052_s16 = smov %s1054_s28  ;;  %19 = sbr.rel (!%p17_p5) target bundleno = 7 (0x7), region = 81 }
 0x15b   :  { %431 = vsyncpa [#allocation3], 1 }
 0x15c   :  { %433 = vsyncpa [#allocation3 + $0x1], 1 }
 0x15d   :  { %434 = vsyncpa [#allocation6], 1 }
 0x15e   :  { %435 = vsyncpa [#allocation4], 1 }
 0x15f   :  { %437 = vsyncpa [#allocation4 + $0x1], 1 }

</bundles_post_ra>
